<compile_context>
chip_gen: v7x
topology: tpu7x:2x2x1
jax: 0.10.0
libtpu: 0.0.40
codegen_flags: <defaults>
</compile_context>

<pallas_src>
import jax
import jax.numpy as jnp
from jax.experimental import pallas as pl
from jax.experimental.pallas import tpu as pltpu


# ----------------------------------------------------------------------------
# Tiled kernel (aligned / padded path)
# ----------------------------------------------------------------------------
def _transpose_cat_kernel(x_ref, o_ref):
    # Grid = (i, j, phase).  Exactly one branch fires per grid step, so the
    # output block is always fully overwritten.
    phase = pl.program_id(2)
    tile = x_ref.shape[0]
    nsub = tile // 128  # tile is always a multiple of 128

    @pl.when(phase == 0)
    def _():
        # Top half: output block (j, i) = (input block (i, j)).T
        # Transpose in 128x128 sub-tiles so the compiler never has to keep a
        # whole >=512 block live through the XLU (keeps live vregs ~32,
        # avoids spills at tile 512/1024).
        for r in range(nsub):
            for c in range(nsub):
                o_ref[c * 128:(c + 1) * 128, r * 128:(r + 1) * 128] = (
                    x_ref[r * 128:(r + 1) * 128, c * 128:(c + 1) * 128].T)

    @pl.when(phase == 1)
    def _():
        # Bottom half: identity copy of input block (i, j).  Pure copy ->
        # per-vreg load/store pairs, no long live ranges, safe as one store.
        o_ref[...] = x_ref[...]


def _round_up(x, m):
    return (x + m - 1) // m * m


def _max_tile_for_device():
    """Largest square tile whose double-buffered in+out blocks fit the
    default scoped-VMEM budget of the current chip generation."""
    try:
        kind = jax.devices()[0].device_kind.lower()
    except Exception:
        kind = ""
    # v5e default scoped VMEM is 16 MiB -> cap at 512 (4 MiB double-buffered).
    if ("v5 lite" in kind) or ("v5e" in kind) or ("v5lite" in kind):
        return 512
    # v6e / v7x default scoped VMEM is 32 MiB -> 1024 (16 MiB f32) fits and
    # halves grid-step overhead / doubles DMA row-segment length.
    if ("v6" in kind) or ("v7" in kind) or ("7x" in kind):
        return 1024
    # Unknown / older generations: stay conservative.
    return 512


def _pick_tile(n_pad, max_tile):
    """Largest tile (multiple of 128, <= max_tile) dividing n_pad while
    keeping >= 2 blocks per parallel axis (megacore + pipeline overlap)."""
    for cand in (1024, 512, 256, 128):
        if cand <= max_tile and n_pad % cand == 0 and (n_pad // cand) >= 2:
            return cand
    # n_pad == 128: a single 128 block per axis is unavoidable.
    return 128


def _tiled_transpose_cat(xp, n_pad, tile):
    """xp is (n_pad, n_pad) with n_pad % tile == 0; returns (2*n_pad, n_pad)."""
    nb = n_pad // tile
    itemsize = jnp.dtype(xp.dtype).itemsize

    def out_index_map(i, j, p):
        # p == 0 -> block (j, i)       (transposed block, top half)
        # p == 1 -> block (nb + i, j)  (identity block, bottom half)
        return (p * (nb + i) + (1 - p) * j, p * j + (1 - p) * i)

    return pl.pallas_call(
        _transpose_cat_kernel,
        out_shape=jax.ShapeDtypeStruct((2 * n_pad, n_pad), xp.dtype),
        grid=(nb, nb, 2),
        in_specs=[pl.BlockSpec((tile, tile), lambda i, j, p: (i, j))],
        out_specs=pl.BlockSpec((tile, tile), out_index_map),
        compiler_params=pltpu.CompilerParams(
            dimension_semantics=("parallel", "parallel", "arbitrary")),
        # Purely bandwidth-bound: read N^2, write 2*N^2.
        cost_estimate=pl.CostEstimate(
            flops=0, transcendentals=0,
            bytes_accessed=3 * n_pad * n_pad * itemsize),
    )(xp)


# ----------------------------------------------------------------------------
# Small unaligned path: whole-array blocks, exact (2N, N) output, no pad /
# no post-kernel concatenate (HBM traffic = minimal ~3*N^2 bytes).
# ----------------------------------------------------------------------------
def _small_transpose_cat(x):
    n = x.shape[0]
    itemsize = jnp.dtype(x.dtype).itemsize

    def kernel(x_ref, o_ref):
        xv = x_ref[...]
        o_ref[0:n, :] = xv.T          # top half  : x.T
        o_ref[n:2 * n, :] = xv        # bottom half: x

    return pl.pallas_call(
        kernel,
        out_shape=jax.ShapeDtypeStruct((2 * n, n), x.dtype),
        cost_estimate=pl.CostEstimate(
            flops=0, transcendentals=0, bytes_accessed=3 * n * n * itemsize),
    )(x)


# ----------------------------------------------------------------------------
# Public wrapper
# ----------------------------------------------------------------------------
def transpose_cat(x):
    assert x.ndim == 2 and x.shape[0] == x.shape[1], (
        "torch.cat semantics require a square 2-D input")
    n = x.shape[0]
    itemsize = jnp.dtype(x.dtype).itemsize

    if n % 128 == 0:
        # Aligned fast path: tiled, pipelined, lane-dense stores.
        tile = _pick_tile(n, _max_tile_for_device())
        return _tiled_transpose_cat(x, n, tile)

    # Unaligned N.
    if 3 * n * n * itemsize <= 4 * 1024 * 1024:
        # Small: single whole-array-block kernel, exact output, no padding
        # pass and no post-kernel concatenate.
        return _small_transpose_cat(x)

    # Large unaligned N: robust pad + tiled kernel + slice fallback.
    # (Wrapper pad/slice adds extra HBM passes; acceptable for this rare case.)
    n_pad = _round_up(n, 128)
    xp = jnp.pad(x, ((0, n_pad - n), (0, n_pad - n)))
    tile = _pick_tile(n_pad, _max_tile_for_device())
    out = _tiled_transpose_cat(xp, n_pad, tile)
    # Valid top half: rows [0, n); valid bottom half: rows [n_pad, n_pad + n).
    return jnp.concatenate([out[:n, :n], out[n_pad:n_pad + n, :n]], axis=0)


if __name__ == "__main__":
    key = jax.random.PRNGKey(0)
    k1, k2 = jax.random.split(key)

    # Aligned case: exercises the tiled, pipelined path (nb >= 2 grid).
    n1 = 256
    x1 = jax.random.normal(k1, (n1, n1), dtype=jnp.float32)
    out1 = jax.block_until_ready(transpose_cat(x1))
    ref1 = jnp.concatenate([jnp.transpose(x1).reshape(n1, -1), x1], axis=0)
    assert out1.shape == (2 * n1, n1)
    assert jnp.allclose(out1, ref1), "mismatch vs reference (aligned)"

    # Unaligned case: exercises the small whole-array-block path (no pad,
    # no post-kernel concatenate).
    n2 = 40
    x2 = jax.random.normal(k2, (n2, n2), dtype=jnp.float32)
    out2 = jax.block_until_ready(transpose_cat(x2))
    ref2 = jnp.concatenate([jnp.transpose(x2).reshape(n2, -1), x2], axis=0)
    assert out2.shape == (2 * n2, n2)
    assert jnp.allclose(out2, ref2), "mismatch vs reference (unaligned)"

    print("KERNEL_OK")
</pallas_src>

<mosaic_0001>
module attributes {stable_mosaic.version = 11 : i64} {
  func.func @_transpose_cat_kernel(%arg0: i32, %arg1: i32, %arg2: i32, %arg3: memref<128x128xf32, #tpu.memory_space<vmem>>, %arg4: memref<128x128xf32, #tpu.memory_space<vmem>>) attributes {dimension_semantics = [#tpu.dimension_semantics<parallel>, #tpu.dimension_semantics<parallel>, #tpu.dimension_semantics<arbitrary>], iteration_bounds = array<i64: 2, 2, 2>, scalar_prefetch = 0 : i64, scratch_operands = 0 : i64, tpu.core_type = #tpu.core_type<tc>, window_params = [{transform_indices = @transform_0, window_bounds = array<i64: 128, 128>}, {transform_indices = @transform_1, window_bounds = array<i64: 128, 128>}]} {
    %c0_i32 = arith.constant 0 : i32
    %0 = arith.cmpi eq, %arg2, %c0_i32 : i32
    %1 = arith.extui %0 : i1 to i32
    %c0_i32_0 = arith.constant 0 : i32
    %2 = arith.cmpi ne, %1, %c0_i32_0 : i32
    scf.if %2 {
      %c0 = arith.constant 0 : index
      %c0_2 = arith.constant 0 : index
      %6 = vector.load %arg3[%c0, %c0_2] : memref<128x128xf32, #tpu.memory_space<vmem>>, vector<128x128xf32>
      %7 = tpu.transpose %6, [1, 0] : vector<128x128xf32> -> vector<128x128xf32>
      %c0_3 = arith.constant 0 : index
      %c0_4 = arith.constant 0 : index
      %8 = vector.load %arg4[%c0_3, %c0_4] : memref<128x128xf32, #tpu.memory_space<vmem>>, vector<128x128xf32>
      tpu.vector_store %arg4[%c0_3, %c0_4], %7 {strides = array<i32>} : memref<128x128xf32, #tpu.memory_space<vmem>>, vector<128x128xf32>,
    } else {
    }
    %c1_i32 = arith.constant 1 : i32
    %3 = arith.cmpi eq, %arg2, %c1_i32 : i32
    %4 = arith.extui %3 : i1 to i32
    %c0_i32_1 = arith.constant 0 : i32
    %5 = arith.cmpi ne, %4, %c0_i32_1 : i32
    scf.if %5 {
      %c0 = arith.constant 0 : index
      %c0_2 = arith.constant 0 : index
      %6 = vector.load %arg3[%c0, %c0_2] : memref<128x128xf32, #tpu.memory_space<vmem>>, vector<128x128xf32>
      %c0_3 = arith.constant 0 : index
      %c0_4 = arith.constant 0 : index
      %7 = vector.load %arg4[%c0_3, %c0_4] : memref<128x128xf32, #tpu.memory_space<vmem>>, vector<128x128xf32>
      tpu.vector_store %arg4[%c0_3, %c0_4], %6 {strides = array<i32>} : memref<128x128xf32, #tpu.memory_space<vmem>>, vector<128x128xf32>,
    } else {
    }
    return
  }
  func.func @transform_0(%arg0: i32, %arg1: i32, %arg2: i32) -> (i32, i32) {
    %c0_i32 = arith.constant 0 : i32
    return %arg0, %arg1 : i32, i32
  }
  func.func @transform_1(%arg0: i32, %arg1: i32, %arg2: i32) -> (i32, i32) {
    %c2_i32 = arith.constant 2 : i32
    %0 = arith.addi %c2_i32, %arg0 : i32
    %1 = arith.muli %arg2, %0 : i32
    %c1_i32 = arith.constant 1 : i32
    %2 = arith.subi %c1_i32, %arg2 : i32
    %3 = arith.muli %2, %arg1 : i32
    %4 = arith.addi %1, %3 : i32
    %5 = arith.muli %arg2, %arg1 : i32
    %c1_i32_0 = arith.constant 1 : i32
    %6 = arith.subi %c1_i32_0, %arg2 : i32
    %7 = arith.muli %6, %arg0 : i32
    %8 = arith.addi %5, %7 : i32
    %c0_i32 = arith.constant 0 : i32
    return %4, %8 : i32, i32
  }
}

</mosaic_0001>

<bundles_post_ra>
// kernel: tpu_custom_call.1
= control target key start
LH: loop header
LB: loop body
LE: loop exit
PB: predicated region body
PF: predicated region fallthrough
CT: control target
= control target key end

     0   :  { %s1097_s0 = inlined_call_operand.hbm [shape: f32[256,256], index: 0, kind: input, shape index: {}]   ;;  %s1098_s1 = inlined_call_operand.hbm [shape: f32[512,256], index: 1, kind: output, shape index: {}]  }
   0x1   :  { %1114 = sst [smem:[#allocation18_spill]] %s1097_s0 }
   0x2   :  { %1115 = sst [smem:[#allocation19_spill]] %s1098_s1 }
   0x3   :  { %6 = vsyncpa [#allocation3], 0 }
   0x4   :  { %8 = vsyncpa [#allocation3 + $0x1], 0 }
   0x5   :  { %9 = vsyncpa [#allocation4], 0 }
   0x6   :  { %11 = vsyncpa [#allocation4 + $0x1], 0  ;;  %s743_s6 = smov 0   ;;  %s745_s7 = smov 0  }
   0x7   :  { %s747_s8 = smov 0   ;;  %s749_s9 = smov 0  }
   0x8   :  { %s751_s10 = smov 0   ;;  %s753_s11 = smov 0  }
   0x9   :  { %s755_s12 = smov 0   ;;  %s757_s13 = smov 0  }
   0xa   :  { %s759_s14 = smov 0   ;;  %s761_s15 = smov 0  }
   0xb   :  { %s763_s16 = smov 0   ;;  %s765_s17 = smov 0  }
   0xc   :  { %s767_s18 = smov 0  }
   0xd LB: > { %1116 = sst [smem:[#allocation8_spill]] %s699_s12  ;;  %s1099_s19 = sadd.s32 4294967295, %s723_s18   ;;  %s723_s18 = sphi %s767_s18, %s17_s18   ;;  %s719_s17 = sphi %s765_s17, %s1152_s17   ;;  %s715_s16 = sphi %s763_s16, %s1161_s16   ;;  %s711_s15 = sphi %s761_s15, %s1160_s15   ;;  %s707_s14 = sphi %s759_s14, %s1149_s14   ;;  %s703_s13 = sphi %s757_s13, %s1159_s13   ;;  %s699_s12 = sphi %s755_s12, %s1147_s12   ;;  %s695_s11 = sphi %s753_s11, %s1158_s11   ;;  %s691_s10 = sphi %s751_s10, %s1157_s10   ;;  %s687_s9 = sphi %s749_s9, %s1156_s9   ;;  %s683_s8 = sphi %s747_s8, %s1155_s8   ;;  %s679_s7 = sphi %s745_s7, %s1154_s7   ;;  %s675_s6 = sphi %s743_s6, %s1153_s6  }
   0xe   : > { %1117 = sst [smem:[#allocation9_spill]] %s703_s13  ;;  %s29_s21 = sadd.s32 1, %s711_s15 }
   0xf   : > { %1118 = sst [smem:[#allocation10_spill]] %s707_s14  ;;  %s32_s22 = sadd.s32 1, %s715_s16 }
  0x10   : > { %1119 = sst [smem:[#allocation11_spill]] %s711_s15  ;;  %p30_p0 = scmp.ge.s32.totalorder %s29_s21, 2 }
  0x11   : > { %1120 = sst [smem:[#allocation12_spill]] %s715_s16  ;;  %s36_s23 = sadd.s32 1, %s719_s17 }
  0x12   : > { %1121 = sst [smem:[#allocation13_spill]] %s719_s17  ;;  %p52_p1 = scmp.ne.s32.totalorder %s695_s11, %s691_s10 }
  0x13   : > { %s1163_s21 = smov (%p30_p0, %s29_s21), 0  ;;  %s1165_s22 = smov (!%p30_p0, %s32_s22), %s715_s16 }
  0x14   : > { %1122 = sst [smem:[#allocation14_spill]] %s1163_s21  ;;  %p53_p2 = scmp.eq.s32.totalorder %s723_s18, 0 }
  0x15   : > { %p58_p3 = scmp.ne.s32.totalorder %s691_s10, %s687_s9  ;;  %p34_p4 = scmp.ge.s32.totalorder %s1165_s22, 2 }
  0x16   : > { %p59_p5 = scmp.eq.s32.totalorder %s1099_s19, 0  ;;  %p824_p6 = por %p53_p2, %p52_p1 }
  0x17   : > { %s68_s26 = sadd.s32 2, %s719_s17  ;;  %s1167_s22 = smov (%p34_p4, %s1165_s22), 0 }
  0x18   : > { %1124 = sst [smem:[#allocation15_spill]] %s1167_s22  ;;  %s1169_s23 = smov (!%p34_p4, %s36_s23), %s719_s17 }
  0x19   : > { %s41_s27 = ssub.s32 %s715_s16, %s1167_s22  ;;  %p834_p7 = por %p59_p5, %p58_p3 }
  0x1a   : > { %p38_p8 = scmp.ge.s32.totalorder %s1169_s23, 2  ;;  %s69_s29 = smul.u32 %s711_s15, %s68_s26 }
  0x1b   : > { %s1125_s28 = scalar_select %p834_p7, 1, 0 }
  0x1c   : > { %s70_s30 = ssub.s32 1, %s711_s15  ;;  %s73_s2 = smul.u32 %s711_s15, %s715_s16 }
  0x1d   : > { %1126 = sst [smem:[#allocation16_spill]] %s1125_s28  ;;  %s1171_s23 = smov (%p38_p8, %s1169_s23), 0 }
  0x1e   : > { %1127 = sst [smem:[#allocation17_spill]] %s1171_s23  ;;  %s71_s3 = smul.u32 %s715_s16, %s70_s30 }
  0x1f   : > { %s78_s4 = ssub.s32 1, %s1163_s21  ;;  %s40_s5 = ssub.s32 %s719_s17, %s1171_s23 }
  0x20   : > { %s74_s9 = smul.u32 %s719_s17, %s70_s30  ;;  %s42_s20 = sor.u32 %s41_s27, %s40_s5 }
  0x21   : > { %s72_s26 = sadd.s32 %s71_s3, %s69_s29  ;;  %p43_p9 = scmp.eq.s32.totalorder %s42_s20, 0 }
  0x22   : > { %s75_s19 = sadd.s32 %s74_s9, %s73_s2  ;;  %s76_s24 = sadd.s32 2, %s1171_s23 }
  0x23   : > { %s79_s15 = smul.u32 %s78_s4, %s1167_s22  ;;  %s1128_s1 = sadd.s32 1, %s695_s11 }
  0x24   : > { %s854_s13 = scalar_select %p43_p9, %s695_s11, %s1128_s1  }
  0x25   : > { %s77_s14 = smul.u32 %s76_s24, %s1163_s21  ;;  %s89_s12 = sadd.s32 1, %s683_s8 }
  0x26   : > { %s81_s28 = smul.u32 %s1167_s22, %s1163_s21  ;;  %p99_p10 = scmp.ne.s32.totalorder %s683_s8, %s679_s7 }
  0x27   : > { %s80_s27 = sadd.s32 %s79_s15, %s77_s14  ;;  %s82_s30 = smul.u32 %s78_s4, %s1171_s23 }
  0x28   : > { %s84_s29 = ssub.s32 %s72_s26, %s80_s27  ;;  %s1129_s20 = sadd.s32 4294967295, %s723_s18  }
  0x29   : > { %p100_p11 = scmp.eq.s32.totalorder %s1129_s20, 7  ;;  %s83_s2 = sadd.s32 %s82_s30, %s81_s28 }
  0x2a   : > { %p105_p12 = scmp.ne.s32.totalorder %s679_s7, %s675_s6  ;;  %s85_s3 = ssub.s32 %s75_s19, %s83_s2 }
  0x2b   : > { %p867_p13 = por %p100_p11, %p99_p10  ;;  %s86_s24 = sor.u32 %s85_s3, %s84_s29 }
  0x2c   : > { %s1131_s5 = sadd.s32 4294967294, %s723_s18   ;;  %p87_p1 = scmp.eq.s32.totalorder %s86_s24, 0 }
  0x2d   : > { %s1130_s1 = scalar_select %p867_p13, 1, 0 }
  0x2e   : > { %p106_p0 = scmp.eq.s32.totalorder %s1131_s5, 7  ;;  %p443_p3 = scmp.lt.s32.totalorder %s723_s18, 8 }
  0x2f   : > { %s879_s15 = scalar_select %p87_p1, %s683_s8, %s89_s12  }
  0x30   : > { %p873_p2 = por %p106_p0, %p105_p12  ;;  %s126_s28 = sand.u32 1, %s695_s11  }
  0x31   : > { %s429_s4 = sshll.u32 %s719_s17, 5  ;;  %s414_s19 = sshll.u32 %s126_s28, 7 }
  0x32   : > { %s1132_s14 = scalar_select %p873_p2, 1, 0 }
  0x33   : > { %s136_s9 = sadd.s32 %s715_s16, %s429_s4  ;;  %s130_s27 = scalar_lea.vmem [#allocation2], %s414_s19 }
  0x34   : > { %s417_s26 = sshll.u32 %s136_s9, 7  ;;  %s139_s30 = sshll.u32 %s130_s27, 4  ;;  %s889_s30 = int_to_ptr.vmem [resolvable:$true] %s139_s30 }
  0x35   : > { %s1133_s0 = sld [smem:[#allocation18_spill]]  ;;  %p893_p4 = pnand %p443_p3, %p824_p6 }
  0x36   : > { %s898_s3 = scalar_lea.sflag [#allocation3], %s126_s28 }
  0x37   : > { %p557_p9 = pneg %p893_p4 }
  0x3b   : > { %s887_s2 = scalar_lea.hbm %s1133_s0, %s417_s26  ;;  %s560_s25 = scalar_lea.hbm %s1133_s0, 8192 }
  0x3c   : > { %s555_s24 = scalar_lea.hbm %s887_s2, 2048  ;;  %p561_p6 = scmp.lt.u32.totalorder %s887_s2, %s1133_s0 }
  0x3d   : > { %p556_p8 = scmp.ne.s32.totalorder %s887_s2, %s555_s24  ;;  %p562_p12 = scmp.lt.u32.totalorder %s560_s25, %s555_s24 }
  0x3e   : > { %p564_p1 = scmp.lt.u32.totalorder %s555_s24, %s887_s2 }
  0x3f   : > { %p558_p10 = pnand %p557_p9, %p556_p8  ;;  %p563_p0 = por %p562_p12, %p561_p6 }
  0x41   : > { %p559_p11 = pneg %p558_p10  ;;  %p565_p3 = por %p564_p1, %p563_p0 }
  0x43   : > { %p566_p5 = pnand %p565_p3, %p559_p11 }
  0x45   : > { %569 = shalt.err (!%p566_p5)
}
  0x46   : > { %s570_s28 = scalar_lea.vmem %s889_s30, 2048  ;;  %s725_s26 = smov [#allocation2]  }
  0x47   : > { %p571_p8 = scmp.ne.s32.totalorder %s889_s30, %s570_s28  ;;  %s575_s27 = sshll.u32 %s725_s26, 4  ;;  %s576_s27 = int_to_ptr.vmem [resolvable:$false] %s575_s27 }
  0x48   : > { %s577_s20 = scalar_lea.vmem %s576_s27, 4096  ;;  %p578_p13 = scmp.lt.s32.totalorder %s889_s30, %s576_s27 }
  0x49   : > { %p573_p10 = pnand %p571_p8, %p557_p9  ;;  %p579_p6 = scmp.lt.s32.totalorder %s577_s20, %s570_s28 }
  0x4b   : > { %p574_p2 = pneg %p573_p10  ;;  %p580_p12 = por %p579_p6, %p578_p13 }
  0x4d   : > { %p581_p0 = pnand %p580_p12, %p574_p2 }
  0x4f   : > { %584 = shalt.err (!%p581_p0)
}
  0x50   : > { %s726_s29 = smov 256   ;;  %s727_s24 = smov 128  }
  0x51   : > { %s728_s5 = smov 8   ;;  %p147_p5 = scmp.lt.s32.totalorder %s723_s18, 9 }
  0x52   : > { %438 = dma.hbm_to_vmem [thread:$0]  (!%p893_p4), %s887_s2, 2048, %s889_s30, %s898_s3, %s726_s29, %s727_s24, %s728_s5  }
  0x53   : > { %p1135_p9 = scmp.ge.s32.totalorder %s723_s18, 1 }
  0x55   : > { %p148_p11 = pnand %p1135_p9, %p147_p5 }
  0x56   : > { %s153_s25 = sand.u32 (!%p148_p11), 1, %s691_s10  }
  0x57   : > { %151 = sbr.rel (%p148_p11) target bundleno = 345 (0x159), region = 24  ;;  %s419_s19 = sshll.u32 (!%p148_p11), %s153_s25, 7 }
  0x58   : > { %s154_s9 = scalar_lea.sflag (!%p148_p11), [#allocation3], %s153_s25  ;;  %s930_s28 = scalar_lea.vmem (!%p148_p11), [#allocation2], %s419_s19 }
  0x5e   : > { %666 = dma.done.wait (%p834_p7), %s154_s9, 2048  }
  0x5f   : > { %668 = vsyncadd (%p834_p7), %s154_s9, 4294965248  ;;  %s1108_s12 = sand.u32 1, %s679_s7   ;;  %s1137_s3 = sld [smem:[#allocation8_spill]] }
  0x60   : > { %s420_s30 = sshll.u32 %s1108_s12, 7 }
  0x61   : > { %s939_s2 = scalar_lea.vmem [#allocation5], %s420_s30 }
  0x65   : > { %p421_p13 = scmp.ne.s32.totalorder %s1137_s3, 0 }
  0x66   : > { %v190_v0 = vld [vmem:[%s930_s28] sm:$0xff] (!%p421_p13)  ;;  %v191_v1 = vld [vmem:[%s930_s28 + $0x8] sm:$0xff] (!%p421_p13)  ;;  %v192_v2 = vld [vmem:[%s930_s28 + $0x10] sm:$0xff] (!%p421_p13) }
  0x67   : > { %189 = sbr.rel (%p421_p13) target bundleno = 293 (0x125), region = 32  ;;  %206 = vxpose.xlu0.b32.start [1/16] (!%p421_p13), %v190_v0, 128  ;;  %v193_v3 = vld [vmem:[%s930_s28 + $0x18] sm:$0xff] (!%p421_p13)  ;;  %v194_v4 = vld [vmem:[%s930_s28 + $0x20] sm:$0xff] (!%p421_p13)  ;;  %v195_v5 = vld [vmem:[%s930_s28 + $0x28] sm:$0xff] (!%p421_p13) }
  0x68   : > { %v196_v6 = vld [vmem:[%s930_s28 + $0x30] sm:$0xff] (!%p421_p13)  ;;  %v197_v7 = vld [vmem:[%s930_s28 + $0x38] sm:$0xff] (!%p421_p13)  ;;  %v198_v8 = vld [vmem:[%s930_s28 + $0x40] sm:$0xff] (!%p421_p13) }
  0x69   : > { %v199_v9 = vld [vmem:[%s930_s28 + $0x48] sm:$0xff] (!%p421_p13)  ;;  %v200_v10 = vld [vmem:[%s930_s28 + $0x50] sm:$0xff] (!%p421_p13)  ;;  %v201_v11 = vld [vmem:[%s930_s28 + $0x58] sm:$0xff] (!%p421_p13) }
  0x6a   : > { %v202_v12 = vld [vmem:[%s930_s28 + $0x60] sm:$0xff] (!%p421_p13)  ;;  %v203_v13 = vld [vmem:[%s930_s28 + $0x68] sm:$0xff] (!%p421_p13)  ;;  %v204_v14 = vld [vmem:[%s930_s28 + $0x70] sm:$0xff] (!%p421_p13) }
  0x6b   : > { %207 = vxpose.xlu0.b32.cont [2/16] (!%p421_p13), %v191_v1, 128  ;;  %v205_v15 = vld [vmem:[%s930_s28 + $0x78] sm:$0xff] (!%p421_p13) }
  0x6f   : > { %208 = vxpose.xlu0.b32.cont [3/16] %v192_v2, 128 }
  0x73   : > { %209 = vxpose.xlu0.b32.cont [4/16] %v193_v3, 128 }
  0x77   : > { %210 = vxpose.xlu0.b32.cont [5/16] %v194_v4, 128 }
  0x7b   : > { %211 = vxpose.xlu0.b32.cont [6/16] %v195_v5, 128 }
  0x7f   : > { %212 = vxpose.xlu0.b32.cont [7/16] %v196_v6, 128 }
  0x83   : > { %213 = vxpose.xlu0.b32.cont [8/16] %v197_v7, 128 }
  0x87   : > { %214 = vxpose.xlu0.b32.cont [9/16] %v198_v8, 128 }
  0x8b   : > { %215 = vxpose.xlu0.b32.cont [10/16] %v199_v9, 128 }
  0x8f   : > { %216 = vxpose.xlu0.b32.cont [11/16] %v200_v10, 128 }
  0x93   : > { %217 = vxpose.xlu0.b32.cont [12/16] %v201_v11, 128 }
  0x97   : > { %218 = vxpose.xlu0.b32.cont [13/16] %v202_v12, 128 }
  0x9b   : > { %219 = vxpose.xlu0.b32.cont [14/16] %v203_v13, 128 }
  0x9f   : > { %220 = vxpose.xlu0.b32.cont [15/16] %v204_v14, 128 }
  0xa3   : > { %221 = vxpose.xlu0.b32.end [16/16] %v205_v15, 128 }
  0xe7   : > { %v222_v16 = vpop.trf.xlu0 }
  0xe8   : > { %238 = vst [vmem:[%s939_s2] sm:$0xff] %v222_v16 }
  0xeb   : > { %v223_v17 = vpop.trf.xlu0 }
  0xec   : > { %239 = vst [vmem:[%s939_s2 + $0x8] sm:$0xff] %v223_v17 }
  0xef   : > { %v224_v18 = vpop.trf.xlu0 }
  0xf0   : > { %240 = vst [vmem:[%s939_s2 + $0x10] sm:$0xff] %v224_v18 }
  0xf3   : > { %v225_v19 = vpop.trf.xlu0 }
  0xf4   : > { %241 = vst [vmem:[%s939_s2 + $0x18] sm:$0xff] %v225_v19 }
  0xf7   : > { %v226_v20 = vpop.trf.xlu0 }
  0xf8   : > { %242 = vst [vmem:[%s939_s2 + $0x20] sm:$0xff] %v226_v20 }
  0xfb   : > { %v227_v21 = vpop.trf.xlu0 }
  0xfc   : > { %243 = vst [vmem:[%s939_s2 + $0x28] sm:$0xff] %v227_v21 }
  0xff   : > { %v228_v22 = vpop.trf.xlu0 }
 0x100   : > { %244 = vst [vmem:[%s939_s2 + $0x30] sm:$0xff] %v228_v22 }
 0x103   : > { %v229_v23 = vpop.trf.xlu0 }
 0x104   : > { %245 = vst [vmem:[%s939_s2 + $0x38] sm:$0xff] %v229_v23 }
 0x107   : > { %v230_v24 = vpop.trf.xlu0 }
 0x108   : > { %246 = vst [vmem:[%s939_s2 + $0x40] sm:$0xff] %v230_v24 }
 0x10b   : > { %v231_v25 = vpop.trf.xlu0 }
 0x10c   : > { %247 = vst [vmem:[%s939_s2 + $0x48] sm:$0xff] %v231_v25 }
 0x10f   : > { %v232_v26 = vpop.trf.xlu0 }
 0x110   : > { %248 = vst [vmem:[%s939_s2 + $0x50] sm:$0xff] %v232_v26 }
 0x113   : > { %v233_v27 = vpop.trf.xlu0 }
 0x114   : > { %249 = vst [vmem:[%s939_s2 + $0x58] sm:$0xff] %v233_v27 }
 0x117   : > { %v234_v28 = vpop.trf.xlu0 }
 0x118   : > { %250 = vst [vmem:[%s939_s2 + $0x60] sm:$0xff] %v234_v28 }
 0x11b   : > { %v235_v29 = vpop.trf.xlu0 }
 0x11c   : > { %251 = vst [vmem:[%s939_s2 + $0x68] sm:$0xff] %v235_v29 }
 0x11f   : > { %v236_v30 = vpop.trf.xlu0 }
 0x120   : > { %252 = vst [vmem:[%s939_s2 + $0x70] sm:$0xff] %v236_v30 }
 0x123   : > { %v237_v31 = vpop.trf.xlu0 }
 0x124   : > { %253 = vst [vmem:[%s939_s2 + $0x78] sm:$0xff] %v237_v31 }
 0x125 PF: > { %s1138_s26 = sld [smem:[#allocation8_spill]] }
 0x12b   : > { %p422_p7 = scmp.ne.s32.totalorder %s1138_s26, 1 }
 0x12c   : > { %v258_v32 = vld [vmem:[%s930_s28] sm:$0xff] (!%p422_p7)  ;;  %v259_v33 = vld [vmem:[%s930_s28 + $0x8] sm:$0xff] (!%p422_p7)  ;;  %v260_v34 = vld [vmem:[%s930_s28 + $0x10] sm:$0xff] (!%p422_p7) }
 0x12d   : > { %257 = sbr.rel (%p422_p7) target bundleno = 309 (0x135), region = 36  ;;  %274 = vst [vmem:[%s939_s2] sm:$0xff] (!%p422_p7), %v258_v32  ;;  %275 = vst [vmem:[%s939_s2 + $0x8] sm:$0xff] (!%p422_p7), %v259_v33  ;;  %v261_v35 = vld [vmem:[%s930_s28 + $0x18] sm:$0xff] (!%p422_p7)  ;;  %v262_v36 = vld [vmem:[%s930_s28 + $0x20] sm:$0xff] (!%p422_p7) }
 0x12e   : > { %276 = vst [vmem:[%s939_s2 + $0x10] sm:$0xff] (!%p422_p7), %v260_v34  ;;  %v263_v37 = vld [vmem:[%s930_s28 + $0x28] sm:$0xff] (!%p422_p7)  ;;  %277 = vst [vmem:[%s939_s2 + $0x18] sm:$0xff] (!%p422_p7), %v261_v35  ;;  %v264_v38 = vld [vmem:[%s930_s28 + $0x30] sm:$0xff] (!%p422_p7) }
 0x12f   : > { %278 = vst [vmem:[%s939_s2 + $0x20] sm:$0xff] (!%p422_p7), %v262_v36  ;;  %279 = vst [vmem:[%s939_s2 + $0x28] sm:$0xff] (!%p422_p7), %v263_v37  ;;  %v265_v39 = vld [vmem:[%s930_s28 + $0x38] sm:$0xff] (!%p422_p7)  ;;  %v266_v40 = vld [vmem:[%s930_s28 + $0x40] sm:$0xff] (!%p422_p7) }
 0x130   : > { %280 = vst [vmem:[%s939_s2 + $0x30] sm:$0xff] (!%p422_p7), %v264_v38  ;;  %281 = vst [vmem:[%s939_s2 + $0x38] sm:$0xff] (!%p422_p7), %v265_v39  ;;  %v267_v41 = vld [vmem:[%s930_s28 + $0x48] sm:$0xff] (!%p422_p7)  ;;  %v268_v42 = vld [vmem:[%s930_s28 + $0x50] sm:$0xff] (!%p422_p7) }
 0x131   : > { %282 = vst [vmem:[%s939_s2 + $0x40] sm:$0xff] (!%p422_p7), %v266_v40  ;;  %v269_v43 = vld [vmem:[%s930_s28 + $0x58] sm:$0xff] (!%p422_p7)  ;;  %283 = vst [vmem:[%s939_s2 + $0x48] sm:$0xff] (!%p422_p7), %v267_v41  ;;  %v270_v44 = vld [vmem:[%s930_s28 + $0x60] sm:$0xff] (!%p422_p7) }
 0x132   : > { %284 = vst [vmem:[%s939_s2 + $0x50] sm:$0xff] (!%p422_p7), %v268_v42  ;;  %285 = vst [vmem:[%s939_s2 + $0x58] sm:$0xff] (!%p422_p7), %v269_v43  ;;  %v271_v45 = vld [vmem:[%s930_s28 + $0x68] sm:$0xff] (!%p422_p7)  ;;  %v272_v46 = vld [vmem:[%s930_s28 + $0x70] sm:$0xff] (!%p422_p7) }
 0x133   : > { %286 = vst [vmem:[%s939_s2 + $0x60] sm:$0xff] (!%p422_p7), %v270_v44  ;;  %287 = vst [vmem:[%s939_s2 + $0x68] sm:$0xff] (!%p422_p7), %v271_v45  ;;  %v273_v47 = vld [vmem:[%s930_s28 + $0x78] sm:$0xff] (!%p422_p7) }
 0x134   : > { %288 = vst [vmem:[%s939_s2 + $0x70] sm:$0xff] %v272_v46  ;;  %289 = vst [vmem:[%s939_s2 + $0x78] sm:$0xff] %v273_v47 }
 0x135 PF: > { %s1139_s27 = sld [smem:[#allocation10_spill]]  ;;  %s1140_s20 = sld [smem:[#allocation8_spill]] }
 0x136   : > { %s1141_s29 = sld [smem:[#allocation9_spill]]  ;;  %s314_s19 = sshll.u32 %s939_s2, 4  ;;  %s1014_s19 = int_to_ptr.vmem [resolvable:$true] %s314_s19 }
 0x137   : > { %s1142_s21 = sld [smem:[#allocation19_spill]]  ;;  %s1143_s17 = sand.u32 1, %s679_s7  }
 0x138   : > { %s1024_s16 = scalar_lea.sflag [#allocation4], %s1143_s17  ;;  %s585_s2 = scalar_lea.vmem %s1014_s19, 2048 }
 0x139   : > { %p586_p2 = scmp.ne.s32.totalorder %s1014_s19, %s585_s2  ;;  %p1144_p4 = scmp.ne.s32.totalorder %s1130_s1, 0 }
 0x13b   : > { %s298_s24 = sadd.s32 2, %s1139_s27  ;;  %s300_s4 = ssub.s32 1, %s1140_s20 }
 0x13c   : > { %s299_s5 = smul.u32 %s1140_s20, %s298_s24  ;;  %p587_p1 = pnand %p586_p2, %p1144_p4 }
 0x13d   : > { %s301_s25 = smul.u32 %s1141_s29, %s300_s4 }
 0x13e   : > { %s303_s9 = smul.u32 %s1140_s20, %s1141_s29  ;;  %p588_p3 = pneg %p587_p1 }
 0x13f   : > { %s302_s28 = sadd.s32 %s301_s25, %s299_s5  ;;  %s304_s30 = smul.u32 %s1139_s27, %s300_s4 }
 0x140   : > { %s430_s3 = sshll.u32 %s302_s28, 5  ;;  %s729_s20 = smov [#allocation5]  }
 0x141   : > { %s305_s26 = sadd.s32 %s304_s30, %s303_s9  ;;  %s589_s29 = sshll.u32 %s729_s20, 4  ;;  %s590_s29 = int_to_ptr.vmem [resolvable:$false] %s589_s29 }
 0x142   : > { %s311_s12 = sadd.s32 %s430_s3, %s305_s26  ;;  %s591_s27 = scalar_lea.vmem %s590_s29, 4096 }
 0x143   : > { %s426_s0 = sshll.u32 %s311_s12, 7  ;;  %p592_p8 = scmp.lt.s32.totalorder %s1014_s19, %s590_s29 }
 0x144   : > { %s1020_s24 = scalar_lea.hbm %s1142_s21, %s426_s0  ;;  %p593_p10 = scmp.lt.s32.totalorder %s591_s27, %s585_s2 }
 0x146   : > { %p594_p6 = por %p593_p10, %p592_p8 }
 0x148   : > { %p595_p12 = pnand %p594_p6, %p588_p3 }
 0x14a   : > { %598 = shalt.err (!%p595_p12)
}
 0x14b   : > { %s599_s0 = scalar_lea.hbm %s1020_s24, 2048  ;;  %s603_s23 = scalar_lea.hbm %s1142_s21, 16384 }
 0x14c   : > { %p600_p0 = scmp.ne.s32.totalorder %s1020_s24, %s599_s0  ;;  %p604_p11 = scmp.lt.u32.totalorder %s1020_s24, %s1142_s21 }
 0x14d   : > { %p605_p13 = scmp.lt.u32.totalorder %s603_s23, %s599_s0  ;;  %p607_p2 = scmp.lt.u32.totalorder %s599_s0, %s1020_s24 }
 0x14e   : > { %p601_p5 = pnand %p600_p0, %p1144_p4 }
 0x14f   : > { %p606_p7 = por %p605_p13, %p604_p11 }
 0x150   : > { %p602_p9 = pneg %p601_p5 }
 0x151   : > { %p608_p1 = por %p607_p2, %p606_p7 }
 0x153   : > { %p609_p3 = pnand %p608_p1, %p602_p9 }
 0x155   : > { %612 = shalt.err (!%p609_p3)
}
 0x156   : > { %s730_s4 = smov 128   ;;  %s731_s25 = smov 256  }
 0x157   : > { %s732_s9 = smov 8  }
 0x158   : > { %433 = dma.vmem_to_hbm [thread:$0]  (%p1144_p4), %s1014_s19, 2048, %s1020_s24, %s1024_s16, %s730_s4, %s731_s25, %s732_s9  }
 0x159 PF: > { %p444_p8 = scmp.ge.s32.totalorder %s723_s18, 2  ;;  %s329_s28 = sand.u32 1, %s675_s6  }
 0x15a   : > { %p1145_p10 = scmp.ne.s32.totalorder %s1132_s14, 0  ;;  %s330_s30 = scalar_lea.sflag [#allocation4], %s329_s28 }
 0x15c   : > { %p440_p6 = pnand %p444_p8, %p1145_p10 }
 0x15e   : > { %670 = dma.done.wait (!%p440_p6), %s330_s30, 2048  }
 0x15f   : > { %672 = vsyncadd (!%p440_p6), %s330_s30, 4294965248  ;;  %s17_s18 = sadd.s32 1, %s723_s18   ;;  %s1147_s12 = sld [smem:[#allocation11_spill]] }
 0x160   : > { %p1053_p12 = scmp.ge.s32.totalorder %s17_s18, 10   ;;  %s1148_s16 = sld [smem:[#allocation12_spill]] }
 0x161   : > { %s1149_s14 = sld [smem:[#allocation13_spill]]  ;;  %s1150_s1 = sld [smem:[#allocation14_spill]] }
 0x162   : > { %s1151_s19 = sld [smem:[#allocation15_spill]]  ;;  %s1152_s17 = sld [smem:[#allocation17_spill]] }
 0x163   : > { %s1153_s6 = smov %s679_s7  ;;  %s1154_s7 = smov %s683_s8 }
 0x164   : > { %s1155_s8 = smov %s879_s15  ;;  %s1156_s9 = smov %s691_s10 }
 0x165   : > { %s1157_s10 = smov %s695_s11  ;;  %s1158_s11 = smov %s854_s13 }
 0x166   : > { %s1159_s13 = smov %s1148_s16  ;;  %16 = sbr.rel (!%p1053_p12) target bundleno = 13 (0xd), region = 77 }
 0x167   : > { %s1160_s15 = smov %s1150_s1 }
 0x168   : > { %s1161_s16 = smov %s1151_s19 }
 0x16d   :  { %335 = vsyncpa [#allocation3], 1 }
 0x16e   :  { %337 = vsyncpa [#allocation3 + $0x1], 1 }
 0x16f   :  { %338 = vsyncpa [#allocation4], 1 }
 0x170   :  { %340 = vsyncpa [#allocation4 + $0x1], 1 }

</bundles_post_ra>
